<compile_context>
chip_gen: v7x
topology: tpu7x:2x2x1
jax: 0.10.0
libtpu: 0.0.40
codegen_flags: <defaults>
</compile_context>

<pallas_src>
import jax
import jax.numpy as jnp
from jax.experimental import pallas as pl
from jax.experimental.pallas import tpu as pltpu

EPS = 1e-5
OUT_FEATURES = 10
OUT_PAD = 128  # lane-dense output slab width

# Row offsets inside the stacked bf16 weight slab (all multiples of 16 -> bf16
# sublane-pack aligned).
_W1_ROWS = (0, 64)      # w1:      (64, 128)
_W2_ROWS = (64, 192)    # w2 pad:  (128, 128)  (output cols 64:128 are zero)
_W3_ROWS = (192, 320)   # w3 pad:  (128, 128)  (rows 64:128 and cols 10:128 zero)

# Row indices inside the f32 param slab (5, 128).
_G1, _BE1, _G2, _BE2, _B3 = 0, 1, 2, 3, 4


def _bn_relu(h, gamma, beta):
    """Training-mode BatchNorm1d (biased variance) + ReLU, all in f32."""
    mu = jnp.mean(h, axis=0, keepdims=True)
    d = h - mu
    var = jnp.mean(d * d, axis=0, keepdims=True)   # two-pass: robust to large mu
    h = d * jax.lax.rsqrt(var + EPS)
    return jnp.maximum(h * gamma + beta, 0.0)


def mlp_bn_kernel(x_ref, w_ref, p_ref, o_ref):
    # Static slices of the stacked weight / param slabs (zero-cost views).
    w1 = w_ref[_W1_ROWS[0]:_W1_ROWS[1], :]
    w2 = w_ref[_W2_ROWS[0]:_W2_ROWS[1], :]
    w3 = w_ref[_W3_ROWS[0]:_W3_ROWS[1], :]
    g1 = p_ref[_G1:_G1 + 1, :]
    be1 = p_ref[_BE1:_BE1 + 1, :]
    g2 = p_ref[_G2:_G2 + 1, :]
    be2 = p_ref[_BE2:_BE2 + 1, :]
    b3 = p_ref[_B3:_B3 + 1, :]

    # ---- fc1 (bias cancelled by BN mean-sub) + BN1 + ReLU ------------------
    h = jnp.dot(x_ref[...].astype(jnp.bfloat16), w1,
                preferred_element_type=jnp.float32)
    h = _bn_relu(h, g1, be1)

    # ---- fc2 (bias cancelled; output padded to 128 lanes) + BN2 + ReLU -----
    # Padded channels are exactly 0 through BN (0-mu=0, *rsqrt, *0, +0) & ReLU.
    h = jnp.dot(h.astype(jnp.bfloat16), w2,
                preferred_element_type=jnp.float32)
    h = _bn_relu(h, g2, be2)

    # ---- fc3: full 128-wide K and N -> full MXU tile + unmasked store ------
    out = jnp.dot(h.astype(jnp.bfloat16), w3,
                  preferred_element_type=jnp.float32) + b3
    o_ref[...] = out.astype(o_ref.dtype)


def prepare_params(params):
    """One-time packing of the PyTorch-style params into the two kernel slabs."""
    (w1, b1, g1, be1, w2, b2, g2, be2, w3, b3) = params
    del b1, b2  # cancelled exactly by training-mode BatchNorm mean subtraction

    # Pad fc2 output columns and fc3 (rows to match, cols lane-dense) to 128.
    w2p = jnp.zeros((128, 128), jnp.float32).at[:, :64].set(w2)
    w3p = jnp.zeros((128, 128), jnp.float32).at[:64, :OUT_FEATURES].set(w3)
    wstack = jnp.concatenate([w1, w2p, w3p], axis=0).astype(jnp.bfloat16)  # (320,128)

    pslab = jnp.zeros((5, 128), jnp.float32)
    pslab = pslab.at[_G1, :].set(g1[0])
    pslab = pslab.at[_BE1, :].set(be1[0])
    pslab = pslab.at[_G2, :64].set(g2[0])
    pslab = pslab.at[_BE2, :64].set(be2[0])
    pslab = pslab.at[_B3, :OUT_FEATURES].set(b3[0])
    return wstack, pslab


@jax.jit
def neural_net_forward(x, wstack, pslab):
    B = x.shape[0]
    flops = 2 * B * (64 * 128 + 128 * 128 + 128 * 128)
    bytes_accessed = (x.size * 4 + wstack.size * 2 + pslab.size * 4
                      + B * OUT_PAD * 4)
    vmem = pl.BlockSpec(memory_space=pltpu.MemorySpace.VMEM)
    out_pad = pl.pallas_call(
        mlp_bn_kernel,
        out_shape=jax.ShapeDtypeStruct((B, OUT_PAD), jnp.float32),
        in_specs=[vmem, vmem, vmem],
        out_specs=vmem,
        cost_estimate=pl.CostEstimate(flops=flops, transcendentals=0,
                                      bytes_accessed=bytes_accessed),
    )(x, wstack, pslab)
    return out_pad[:, :OUT_FEATURES]  # fuses under jit


def init_params(key):
    """Deterministic init mimicking PyTorch Linear defaults (U(-1/sqrt(fan_in), ..))."""
    def linear(key, fan_in, fan_out):
        kw, kb = jax.random.split(key)
        bound = 1.0 / jnp.sqrt(fan_in)
        w = jax.random.uniform(kw, (fan_in, fan_out), jnp.float32, -bound, bound)
        b = jax.random.uniform(kb, (1, fan_out), jnp.float32, -bound, bound)
        return w, b

    k1, k2, k3 = jax.random.split(key, 3)
    w1, b1 = linear(k1, 64, 128)
    w2, b2 = linear(k2, 128, 64)
    w3, b3 = linear(k3, 64, 10)
    # BatchNorm affine params: gamma=1, beta=0 (PyTorch default)
    g1, be1 = jnp.ones((1, 128), jnp.float32), jnp.zeros((1, 128), jnp.float32)
    g2, be2 = jnp.ones((1, 64), jnp.float32), jnp.zeros((1, 64), jnp.float32)
    return (w1, b1, g1, be1, w2, b2, g2, be2, w3, b3)


def reference_forward_f32(x, params):
    """Plain-JAX, full-f32 reference of the PyTorch forward (training-mode BN,
    biases included exactly as nn.Linear does)."""
    (w1, b1, g1, be1, w2, b2, g2, be2, w3, b3) = params

    def bn(h, g, be):
        mu = jnp.mean(h, axis=0, keepdims=True)
        var = jnp.mean((h - mu) ** 2, axis=0, keepdims=True)  # biased variance
        return (h - mu) / jnp.sqrt(var + EPS) * g + be

    h = jnp.maximum(bn(x @ w1 + b1, g1, be1), 0.0)
    h = jnp.maximum(bn(h @ w2 + b2, g2, be2), 0.0)
    return h @ w3 + b3


def reference_forward_matched(x, params):
    """Plain-JAX reference using the same numerics as the kernel (bf16 matmul
    inputs, f32 accumulation, two-pass BN, no fc1/fc2 bias)."""
    (w1, b1, g1, be1, w2, b2, g2, be2, w3, b3) = params

    def bn_relu(h, g, be):
        mu = jnp.mean(h, axis=0, keepdims=True)
        d = h - mu
        var = jnp.mean(d * d, axis=0, keepdims=True)
        return jnp.maximum(d * jax.lax.rsqrt(var + EPS) * g + be, 0.0)

    def mm(a, w):
        return jnp.dot(a.astype(jnp.bfloat16), w.astype(jnp.bfloat16),
                       preferred_element_type=jnp.float32)

    h = bn_relu(mm(x, w1), g1, be1)
    h = bn_relu(mm(h, w2), g2, be2)
    return mm(h, w3) + b3


if __name__ == "__main__":
    key = jax.random.PRNGKey(0)
    kx, kp = jax.random.split(key)

    B = 8  # batch size (>1 required for meaningful BatchNorm stats)
    x = jax.random.normal(kx, (B, 64), jnp.float32)
    params = init_params(kp)
    wstack, pslab = prepare_params(params)   # one-time packing / padding / casts

    out = neural_net_forward(x, wstack, pslab)
    out = jax.block_until_ready(out)
    assert out.shape == (B, OUT_FEATURES)

    # Tight check vs a reference using identical numerics (bf16 MXU inputs).
    ref_matched = reference_forward_matched(x, params)
    assert jnp.allclose(out, ref_matched, atol=2e-3, rtol=2e-3), \
        "mismatch vs numerically-matched reference"

    # Semantics check vs the full-f32 PyTorch-style forward; tolerance sized
    # for the intentional bf16-MXU-input trade-off (BN re-normalizes scale,
    # so the error stays small).
    ref_f32 = reference_forward_f32(x, params)
    assert jnp.allclose(out, ref_f32, atol=5e-2, rtol=5e-2), \
        "mismatch vs f32 PyTorch-semantics reference"

    print("KERNEL_OK")
</pallas_src>

<mosaic_0001>
module attributes {stable_mosaic.version = 11 : i64} {
  func.func @mlp_bn_kernel(%arg0: memref<8x64xf32, #tpu.memory_space<vmem>>, %arg1: memref<320x128xbf16, #tpu.memory_space<vmem>>, %arg2: memref<5x128xf32, #tpu.memory_space<vmem>>, %arg3: memref<8x128xf32, #tpu.memory_space<vmem>>) attributes {dimension_semantics = [], scalar_prefetch = 0 : i64, scratch_operands = 0 : i64, tpu.core_type = #tpu.core_type<tc>} {
    %c0 = arith.constant 0 : index
    %c0_0 = arith.constant 0 : index
    %0 = vector.load %arg1[%c0, %c0_0] : memref<320x128xbf16, #tpu.memory_space<vmem>>, vector<64x128xbf16>
    %c64 = arith.constant 64 : index
    %c0_1 = arith.constant 0 : index
    %1 = vector.load %arg1[%c64, %c0_1] : memref<320x128xbf16, #tpu.memory_space<vmem>>, vector<128x128xbf16>
    %c192 = arith.constant 192 : index
    %c0_2 = arith.constant 0 : index
    %2 = vector.load %arg1[%c192, %c0_2] : memref<320x128xbf16, #tpu.memory_space<vmem>>, vector<128x128xbf16>
    %c0_3 = arith.constant 0 : index
    %c0_4 = arith.constant 0 : index
    %3 = vector.load %arg2[%c0_3, %c0_4] : memref<5x128xf32, #tpu.memory_space<vmem>>, vector<1x128xf32>
    %c1 = arith.constant 1 : index
    %c0_5 = arith.constant 0 : index
    %4 = vector.load %arg2[%c1, %c0_5] : memref<5x128xf32, #tpu.memory_space<vmem>>, vector<1x128xf32>
    %c2 = arith.constant 2 : index
    %c0_6 = arith.constant 0 : index
    %5 = vector.load %arg2[%c2, %c0_6] : memref<5x128xf32, #tpu.memory_space<vmem>>, vector<1x128xf32>
    %c3 = arith.constant 3 : index
    %c0_7 = arith.constant 0 : index
    %6 = vector.load %arg2[%c3, %c0_7] : memref<5x128xf32, #tpu.memory_space<vmem>>, vector<1x128xf32>
    %c4 = arith.constant 4 : index
    %c0_8 = arith.constant 0 : index
    %7 = vector.load %arg2[%c4, %c0_8] : memref<5x128xf32, #tpu.memory_space<vmem>>, vector<1x128xf32>
    %c0_9 = arith.constant 0 : index
    %c0_10 = arith.constant 0 : index
    %8 = vector.load %arg0[%c0_9, %c0_10] : memref<8x64xf32, #tpu.memory_space<vmem>>, vector<8x64xf32>
    %9 = arith.truncf %8 : vector<8x64xf32> to vector<8x64xbf16>
    %cst = arith.constant dense<0.000000e+00> : vector<8x128xf32>
    %10 = tpu.matmul %9, %0, %cst {dimension_numbers = #tpu.dot_dimension_numbers<[1], [0], [0], [1], [0, 0, 1, 1], [], []>} : vector<8x64xbf16>, vector<64x128xbf16>, vector<8x128xf32> -> vector<8x128xf32>
    %cst_11 = arith.constant dense<0.000000e+00> : vector<128xf32>
    %11 = vector.multi_reduction <add>, %10, %cst_11 [0] : vector<8x128xf32> to vector<128xf32>
    %12 = vector.shape_cast %11 : vector<128xf32> to vector<1x128xf32>
    %cst_12 = arith.constant 8.000000e+00 : f32
    %13 = vector.broadcast %cst_12 : f32 to vector<1x128xf32>
    %14 = arith.divf %12, %13 : vector<1x128xf32>
    %15 = vector.broadcast %14 : vector<1x128xf32> to vector<8x128xf32>
    %16 = arith.subf %10, %15 : vector<8x128xf32>
    %17 = arith.mulf %16, %16 : vector<8x128xf32>
    %cst_13 = arith.constant dense<0.000000e+00> : vector<128xf32>
    %18 = vector.multi_reduction <add>, %17, %cst_13 [0] : vector<8x128xf32> to vector<128xf32>
    %19 = vector.shape_cast %18 : vector<128xf32> to vector<1x128xf32>
    %cst_14 = arith.constant 8.000000e+00 : f32
    %20 = vector.broadcast %cst_14 : f32 to vector<1x128xf32>
    %21 = arith.divf %19, %20 : vector<1x128xf32>
    %cst_15 = arith.constant 9.99999974E-6 : f32
    %22 = vector.broadcast %cst_15 : f32 to vector<1x128xf32>
    %23 = arith.addf %21, %22 : vector<1x128xf32>
    %24 = math.rsqrt %23 : vector<1x128xf32>
    %25 = vector.broadcast %24 : vector<1x128xf32> to vector<8x128xf32>
    %26 = arith.mulf %16, %25 : vector<8x128xf32>
    %27 = vector.broadcast %3 : vector<1x128xf32> to vector<8x128xf32>
    %28 = arith.mulf %26, %27 : vector<8x128xf32>
    %29 = vector.broadcast %4 : vector<1x128xf32> to vector<8x128xf32>
    %30 = arith.addf %28, %29 : vector<8x128xf32>
    %cst_16 = arith.constant 0.000000e+00 : f32
    %31 = vector.broadcast %cst_16 : f32 to vector<8x128xf32>
    %32 = arith.maximumf %30, %31 : vector<8x128xf32>
    %33 = arith.truncf %32 : vector<8x128xf32> to vector<8x128xbf16>
    %cst_17 = arith.constant dense<0.000000e+00> : vector<8x128xf32>
    %34 = tpu.matmul %33, %1, %cst_17 {dimension_numbers = #tpu.dot_dimension_numbers<[1], [0], [0], [1], [0, 0, 1, 1], [], []>} : vector<8x128xbf16>, vector<128x128xbf16>, vector<8x128xf32> -> vector<8x128xf32>
    %cst_18 = arith.constant dense<0.000000e+00> : vector<128xf32>
    %35 = vector.multi_reduction <add>, %34, %cst_18 [0] : vector<8x128xf32> to vector<128xf32>
    %36 = vector.shape_cast %35 : vector<128xf32> to vector<1x128xf32>
    %cst_19 = arith.constant 8.000000e+00 : f32
    %37 = vector.broadcast %cst_19 : f32 to vector<1x128xf32>
    %38 = arith.divf %36, %37 : vector<1x128xf32>
    %39 = vector.broadcast %38 : vector<1x128xf32> to vector<8x128xf32>
    %40 = arith.subf %34, %39 : vector<8x128xf32>
    %41 = arith.mulf %40, %40 : vector<8x128xf32>
    %cst_20 = arith.constant dense<0.000000e+00> : vector<128xf32>
    %42 = vector.multi_reduction <add>, %41, %cst_20 [0] : vector<8x128xf32> to vector<128xf32>
    %43 = vector.shape_cast %42 : vector<128xf32> to vector<1x128xf32>
    %cst_21 = arith.constant 8.000000e+00 : f32
    %44 = vector.broadcast %cst_21 : f32 to vector<1x128xf32>
    %45 = arith.divf %43, %44 : vector<1x128xf32>
    %cst_22 = arith.constant 9.99999974E-6 : f32
    %46 = vector.broadcast %cst_22 : f32 to vector<1x128xf32>
    %47 = arith.addf %45, %46 : vector<1x128xf32>
    %48 = math.rsqrt %47 : vector<1x128xf32>
    %49 = vector.broadcast %48 : vector<1x128xf32> to vector<8x128xf32>
    %50 = arith.mulf %40, %49 : vector<8x128xf32>
    %51 = vector.broadcast %5 : vector<1x128xf32> to vector<8x128xf32>
    %52 = arith.mulf %50, %51 : vector<8x128xf32>
    %53 = vector.broadcast %6 : vector<1x128xf32> to vector<8x128xf32>
    %54 = arith.addf %52, %53 : vector<8x128xf32>
    %cst_23 = arith.constant 0.000000e+00 : f32
    %55 = vector.broadcast %cst_23 : f32 to vector<8x128xf32>
    %56 = arith.maximumf %54, %55 : vector<8x128xf32>
    %57 = arith.truncf %56 : vector<8x128xf32> to vector<8x128xbf16>
    %cst_24 = arith.constant dense<0.000000e+00> : vector<8x128xf32>
    %58 = tpu.matmul %57, %2, %cst_24 {dimension_numbers = #tpu.dot_dimension_numbers<[1], [0], [0], [1], [0, 0, 1, 1], [], []>} : vector<8x128xbf16>, vector<128x128xbf16>, vector<8x128xf32> -> vector<8x128xf32>
    %59 = vector.broadcast %7 : vector<1x128xf32> to vector<8x128xf32>
    %60 = arith.addf %58, %59 : vector<8x128xf32>
    %c0_25 = arith.constant 0 : index
    %c0_26 = arith.constant 0 : index
    %61 = vector.load %arg3[%c0_25, %c0_26] : memref<8x128xf32, #tpu.memory_space<vmem>>, vector<8x128xf32>
    tpu.vector_store %arg3[%c0_25, %c0_26], %60 {strides = array<i32>} : memref<8x128xf32, #tpu.memory_space<vmem>>, vector<8x128xf32>,
    return
  }
}

</mosaic_0001>

<bundles_post_ra>
// kernel: neural_net_forward.1
= control target key start
LH: loop header
LB: loop body
LE: loop exit
PB: predicated region body
PF: predicated region fallthrough
CT: control target
= control target key end

     0   :  { %8 = vsyncpa [#allocation3], 0  ;;  %s757_s0 = inlined_call_operand.hbm [shape: f32[8,64], index: 0, kind: input, shape index: {}]   ;;  %s758_s1 = inlined_call_operand.hbm [shape: bf16[320,128], index: 1, kind: input, shape index: {}]   ;;  %s759_s2 = inlined_call_operand.hbm [shape: f32[5,128], index: 2, kind: input, shape index: {}]   ;;  %s760_s3 = inlined_call_operand.hbm [shape: f32[8,128], index: 3, kind: output, shape index: {}]  }
   0x1   :  { %9 = vsyncpa [#allocation6], 0 }
   0x2   :  { %10 = vsyncpa [#allocation4], 0  ;;  %s655_s12 = smov [#allocation5]   ;;  %s561_s16 = scalar_lea.hbm %s758_s1, 2560 }
   0x3   :  { %s26_s13 = sshll.u32 %s655_s12, 4  ;;  %p562_p0 = scmp.ne.s32.totalorder %s758_s1, %s561_s16  ;;  %s27_s13 = int_to_ptr.vmem [resolvable:$true] %s26_s13 }
   0x4   :  { %p565_p1 = scmp.lt.u32.totalorder %s561_s16, %s758_s1 }
   0x6   :  { %p567_p2 = pnand %p565_p1, %p562_p0 }
   0x8   :  { %570 = shalt.err (!%p567_p2)
}
   0x9   :  { %s571_s21 = scalar_lea.vmem %s27_s13, 2560  ;;  %p576_p4 = scmp.lt.s32.totalorder %s27_s13, %s27_s13 }
   0xa   :  { %p572_p3 = scmp.ne.s32.totalorder %s27_s13, %s571_s21  ;;  %p577_p5 = scmp.lt.s32.totalorder %s571_s21, %s571_s21 }
   0xc   :  { %p578_p6 = por %p577_p5, %p576_p4 }
   0xe   :  { %p579_p7 = pnand %p578_p6, %p572_p3 }
  0x10   :  { %582 = shalt.err (!%p579_p7)
}
  0x11   :  { %s656_s22 = smov 64   ;;  %s657_s23 = smov 4  }
  0x12   :  { %32 = dma.hbm_to_vmem [thread:$0]  %s758_s1, 2560, %s27_s13, [#allocation6], %s656_s22, %s656_s22, %s657_s23  }
  0x13   :  { %s658_s26 = smov [#allocation2]   ;;  %s659_s28 = smov [#allocation7]  }
  0x14   :  { %s17_s27 = sshll.u32 %s658_s26, 4  ;;  %s39_s29 = sshll.u32 %s659_s28, 4  ;;  %s18_s27 = int_to_ptr.vmem [resolvable:$true] %s17_s27  ;;  %s40_s29 = int_to_ptr.vmem [resolvable:$true] %s39_s29 }
  0x15   :  { %s583_s5 = scalar_lea.hbm %s757_s0, 128 }
  0x16   :  { %p584_p8 = scmp.ne.s32.totalorder %s757_s0, %s583_s5  ;;  %p587_p9 = scmp.lt.u32.totalorder %s583_s5, %s757_s0 }
  0x18   :  { %p589_p10 = pnand %p587_p9, %p584_p8 }
  0x1a   :  { %592 = shalt.err (!%p589_p10)
}
  0x1b   :  { %s593_s1 = scalar_lea.vmem %s18_s27, 128  ;;  %p598_p12 = scmp.lt.s32.totalorder %s18_s27, %s18_s27 }
  0x1c   :  { %p594_p11 = scmp.ne.s32.totalorder %s18_s27, %s593_s1  ;;  %p599_p13 = scmp.lt.s32.totalorder %s593_s1, %s593_s1 }
  0x1e   :  { %p600_p0 = por %p599_p13, %p598_p12 }
  0x20   :  { %p601_p1 = pnand %p600_p0, %p594_p11 }
  0x22   :  { %604 = shalt.err (!%p601_p1)
}
  0x23   :  { %20 = dma.hbm_to_vmem [thread:$0]  %s757_s0, 128, %s18_s27, [#allocation3]  }
  0x24   :  { %s605_s14 = scalar_lea.hbm %s759_s2, 128 }
  0x25   :  { %p606_p2 = scmp.ne.s32.totalorder %s759_s2, %s605_s14  ;;  %p609_p3 = scmp.lt.u32.totalorder %s605_s14, %s759_s2 }
  0x27   :  { %p611_p4 = pnand %p609_p3, %p606_p2 }
  0x29   :  { %614 = shalt.err (!%p611_p4)
}
  0x2a   :  { %s615_s19 = scalar_lea.vmem %s40_s29, 128  ;;  %p620_p6 = scmp.lt.s32.totalorder %s40_s29, %s40_s29 }
  0x2b   :  { %p616_p5 = scmp.ne.s32.totalorder %s40_s29, %s615_s19  ;;  %p621_p7 = scmp.lt.s32.totalorder %s615_s19, %s615_s19 }
  0x2d   :  { %p622_p8 = por %p621_p7, %p620_p6 }
  0x2f   :  { %p623_p9 = pnand %p622_p8, %p616_p5 }
  0x31   :  { %626 = shalt.err (!%p623_p9)
}
  0x32   :  { %42 = dma.hbm_to_vmem [thread:$0]  %s759_s2, 128, %s40_s29, [#allocation6]  }
  0x33   :  { %649 = dma.done.wait [#allocation3], 128  }
  0x34   :  { %650 = vsyncadd [#allocation3], 4294967168 }
  0x35   :  { %651 = dma.done.wait [#allocation6], 2688  }
  0x36   :  { %652 = vsyncadd [#allocation6], 4294964608  ;;  %v660_v0 = vmov 0.0   ;;  %vm661_vm0 = vmmov 0   ;;  %v537_v1 = vld [vmem:[#allocation5] sm:$0xff]   ;;  %v538_v2 = vld [vmem:[#allocation5 + $0x8] sm:$0xff]  }
  0x37   :  { %477 = vmatprep.subr.bf16.mxu0 %v660_v0  ;;  %485 = vmatprep.mubr.msk.bf16.mxu0 %vm661_vm0, %v660_v0  ;;  %v539_v3 = vld [vmem:[#allocation5 + $0x10] sm:$0xff]   ;;  %vm124_vm1 = vcmask 523264   ;;  %v540_v4 = vld [vmem:[#allocation5 + $0x18] sm:$0xff]   ;;  %v541_v7 = vld [vmem:[#allocation5 + $0x20] sm:$0xff]   ;;  %s662_s2 = smov [#allocation8]  }
  0x38   :  { %489 = vmatprep.subr.bf16.mxu1 %v660_v0  ;;  %505 = vmatprep.mubr.msk.bf16.mxu1 %vm661_vm0, %v660_v0  ;;  %v98_v5 = vld [vmem:[#allocation2] sm:$0xff]  ;;  %v542_v8 = vld [vmem:[#allocation5 + $0x28] sm:$0xff]   ;;  %v543_v9 = vld [vmem:[#allocation5 + $0x30] sm:$0xff]   ;;  %s418_s21 = sshll.u32 %s662_s2, 4  ;;  %s419_s21 = int_to_ptr.vmem [resolvable:$true] %s418_s21 }
  0x39   :  { %478 = vmatpush3.bf16.msra.mxu0 %v537_v1  ;;  %v99_v6 = vpack.c.bf16 %v98_v5, %v98_v5  ;;  %490 = vmatpush3.bf16.msra.mxu1 %v541_v7  ;;  %v544_v10 = vld [vmem:[#allocation5 + $0x38] sm:$0xff]   ;;  %v545_v11 = vld [vmem:[#allocation5 + $0x40] sm:$0xff]   ;;  %v546_v12 = vld [vmem:[#allocation5 + $0x48] sm:$0xff]   ;;  %s627_s22 = scalar_lea.vmem %s419_s21, 128  ;;  %p632_p11 = scmp.lt.s32.totalorder %s419_s21, %s419_s21 }
  0x3a   :  { %479 = vmatprep.subr.bf16.mxu0 %v660_v0  ;;  %491 = vmatprep.subr.bf16.mxu1 %v660_v0  ;;  %v547_v13 = vld [vmem:[#allocation5 + $0x50] sm:$0xff]   ;;  %v548_v14 = vld [vmem:[#allocation5 + $0x58] sm:$0xff]   ;;  %v433_v37 = vld [vmem:[#allocation7] ss:$0 sm:$0xff]  ;;  %p628_p10 = scmp.ne.s32.totalorder %s419_s21, %s627_s22  ;;  %p633_p12 = scmp.lt.s32.totalorder %s627_s22, %s627_s22 }
  0x3b   :  { %v434_v39 = vld [vmem:[#allocation7 + $0x1] ss:$0 sm:$0xff]  ;;  %v550_v45 = vld [vmem:[#allocation5 + $0x68] sm:$0xff]   ;;  %v551_v46 = vld [vmem:[#allocation5 + $0x70] sm:$0xff]  }
  0x3c   :  { %v549_v44 = vld [vmem:[#allocation5 + $0x60] sm:$0xff]   ;;  %v552_v47 = vld [vmem:[#allocation5 + $0x78] sm:$0xff]   ;;  %v554_v49 = vld [vmem:[#allocation5 + $0x88] sm:$0xff]   ;;  %p634_p13 = por %p633_p12, %p632_p11 }
  0x3d   :  { %480 = vmatpush3.bf16.msra.mxu0 %v538_v2  ;;  %492 = vmatpush3.bf16.msra.mxu1 %v542_v8  ;;  %v553_v48 = vld [vmem:[#allocation5 + $0x80] sm:$0xff]   ;;  %v555_v50 = vld [vmem:[#allocation5 + $0x90] sm:$0xff]   ;;  %v556_v51 = vld [vmem:[#allocation5 + $0x98] sm:$0xff]  }
  0x3e   :  { %481 = vmatprep.subr.bf16.mxu0 %v660_v0  ;;  %493 = vmatprep.subr.bf16.mxu1 %v660_v0  ;;  %p635_p0 = pnand %p634_p13, %p628_p10 }
  0x41   :  { %482 = vmatpush3.bf16.msra.mxu0 %v539_v3  ;;  %494 = vmatpush3.bf16.msra.mxu1 %v543_v9 }
  0x42   :  { %483 = vmatprep.subr.bf16.mxu0 %v660_v0  ;;  %495 = vmatprep.subr.bf16.mxu1 %v660_v0 }
  0x45   :  { %484 = vmatpush3.bf16.msra.mxu0 %v540_v4  ;;  %496 = vmatpush3.bf16.msra.mxu1 %v544_v10  ;;  %v443_v10 = vld [vmem:[#allocation7 + $0x2] ss:$0 sm:$0xff] }
  0x46   :  { %509 = vmatprep.subr.bf16.mxu0 %v660_v0  ;;  %497 = vmatprep.subr.bf16.mxu1 %v660_v0 }
  0x48   :  { %486 = vmatmul.mubr.msk.bf16.vlgmr.msra.gmra.mrb[0].mxu0 %vm124_vm1, %v99_v6 }
  0x49   :  { %525 = vmatprep.mubr.msk.bf16.mxu0 %vm661_vm0, %v660_v0  ;;  %498 = vmatpush3.bf16.msra.mxu1 %v545_v11 }
  0x4a   :  { %499 = vmatprep.subr.bf16.mxu1 %v660_v0  ;;  %510 = vmatpush3.bf16.msra.mxu0 %v549_v44 }
  0x4b   :  { %511 = vmatprep.subr.bf16.mxu0 %v660_v0 }
  0x4d   :  { %500 = vmatpush3.bf16.msra.mxu1 %v546_v12  ;;  %v444_v12 = vld [vmem:[#allocation7 + $0x3] ss:$0 sm:$0xff] }
  0x4e   :  { %501 = vmatprep.subr.bf16.mxu1 %v660_v0  ;;  %512 = vmatpush3.bf16.msra.mxu0 %v550_v45 }
  0x4f   :  { %513 = vmatprep.subr.bf16.mxu0 %v660_v0 }
  0x51   :  { %502 = vmatpush3.bf16.msra.mxu1 %v547_v13 }
  0x52   :  { %503 = vmatprep.subr.bf16.mxu1 %v660_v0  ;;  %514 = vmatpush3.bf16.msra.mxu0 %v551_v46 }
  0x53   :  { %515 = vmatprep.subr.bf16.mxu0 %v660_v0 }
  0x55   :  { %504 = vmatpush3.bf16.msra.mxu1 %v548_v14 }
  0x56   :  { %516 = vmatpush3.bf16.msra.mxu0 %v552_v47 }
  0x57   :  { %517 = vmatprep.subr.bf16.mxu0 %v660_v0 }
  0x5a   :  { %518 = vmatpush3.bf16.msra.mxu0 %v553_v48 }
  0x5b   :  { %519 = vmatprep.subr.bf16.mxu0 %v660_v0 }
  0x5e   :  { %520 = vmatpush3.bf16.msra.mxu0 %v554_v49 }
  0x5f   :  { %521 = vmatprep.subr.bf16.mxu0 %v660_v0 }
  0x62   :  { %522 = vmatpush3.bf16.msra.mxu0 %v555_v50 }
  0x63   :  { %523 = vmatprep.subr.bf16.mxu0 %v660_v0 }
  0x66   :  { %524 = vmatpush3.bf16.msra.mxu0 %v556_v51 }
 0x11b   :  { %v162_v15 = vpop.f32.mrb[0].mxu0 }
 0x11c   :  { %v168_v16 = vrot.slane %v162_v15, 4  ;;  %v487_v17 = vpop.f32.mrb[1].mxu0 }
 0x11d   :  { %v165_v18 = vpop.f32.mrb[2].mxu0  ;;  %v445_v17 = vld [vmem:[#allocation7 + $0x4] ss:$0 sm:$0xff] }
 0x11e   :  { %v169_v19 = vadd.f32 %v168_v16, %v162_v15  ;;  %v488_v20 = vpop.f32.mrb[3].mxu0 }
 0x120   :  { %v170_v21 = vrot.slane %v169_v19, 2 }
 0x122   :  { %v171_v22 = vadd.f32 %v170_v21, %v169_v19 }
 0x124   :  { %v172_v23 = vrot.slane %v171_v22, 1 }
 0x126   :  { %v173_v24 = vadd.f32 %v172_v23, %v171_v22 }
 0x128   :  { %v175_v25 = vmul.f32 0.125, %v173_v24 }
 0x12a   :  { %v176_v26 = vsub.f32 %v162_v15, %v175_v25 }
 0x12c   :  { %v177_v27 = vmul.f32 %v176_v26, %v176_v26 }
 0x12e   :  { %v178_v28 = vrot.slane %v177_v27, 4 }
 0x130   :  { %v179_v29 = vadd.f32 %v178_v28, %v177_v27 }
 0x132   :  { %v180_v30 = vrot.slane %v179_v29, 2 }
 0x134   :  { %v181_v31 = vadd.f32 %v180_v30, %v179_v29 }
 0x136   :  { %v182_v32 = vrot.slane %v181_v31, 1 }
 0x138   :  { %v183_v33 = vadd.f32 %v182_v32, %v181_v31 }
 0x13a   :  { %v184_v34 = vmul.f32 0.125, %v183_v33 }
 0x13c   :  { %v185_v35 = vadd.f32 1e-05, %v184_v34 }
 0x13e   :  { %557 = vrsqrt.f32 %v185_v35 }
 0x148   :  { %v558_v36 = vpop.eup %557 }
 0x149   :  { %v187_v38 = vmul.f32 %v558_v36, %v176_v26 }
 0x14b   :  { %v192_v40 = vmul.f32 %v433_v37, %v187_v38 }
 0x14d   :  { %v197_v41 = vadd.f32 %v434_v39, %v192_v40 }
 0x14f   :  { %v198_v42 = vmax.f32 %v197_v41, 0.0 }
 0x151   :  { %v199_v43 = vpack.c.bf16 %v198_v42, %v198_v42 }
 0x153   :  { %506 = vmatmul.mubr.bf16.vlgmr.msra.gmra.mrb[0].mxu1 %v199_v43 }
 0x226   :  { %v282_v52 = vpop.f32.mrb[0].mxu1 }
 0x227   :  { %v288_v53 = vrot.slane %v282_v52, 4  ;;  %v507_v54 = vpop.f32.mrb[1].mxu1 }
 0x228   :  { %v285_v55 = vpop.f32.mrb[2].mxu1 }
 0x229   :  { %v289_v56 = vadd.f32 %v288_v53, %v282_v52  ;;  %v508_v57 = vpop.f32.mrb[3].mxu1 }
 0x22b   :  { %v290_v58 = vrot.slane %v289_v56, 2 }
 0x22d   :  { %v291_v59 = vadd.f32 %v290_v58, %v289_v56 }
 0x22f   :  { %v292_v60 = vrot.slane %v291_v59, 1 }
 0x231   :  { %v293_v61 = vadd.f32 %v292_v60, %v291_v59 }
 0x233   :  { %v294_v62 = vmul.f32 0.125, %v293_v61 }
 0x235   :  { %v295_v63 = vsub.f32 %v282_v52, %v294_v62 }
 0x237   :  { %v296_v1 = vmul.f32 %v295_v63, %v295_v63 }
 0x239   :  { %v297_v2 = vrot.slane %v296_v1, 4 }
 0x23b   :  { %v298_v3 = vadd.f32 %v297_v2, %v296_v1 }
 0x23d   :  { %v299_v4 = vrot.slane %v298_v3, 2 }
 0x23f   :  { %v300_v5 = vadd.f32 %v299_v4, %v298_v3 }
 0x241   :  { %v301_v6 = vrot.slane %v300_v5, 1 }
 0x243   :  { %v302_v0 = vadd.f32 %v301_v6, %v300_v5 }
 0x245   :  { %v303_v7 = vmul.f32 0.125, %v302_v0 }
 0x247   :  { %v304_v8 = vadd.f32 1e-05, %v303_v7 }
 0x249   :  { %559 = vrsqrt.f32 %v304_v8 }
 0x253   :  { %v560_v9 = vpop.eup %559 }
 0x254   :  { %v306_v11 = vmul.f32 %v560_v9, %v295_v63 }
 0x256   :  { %v311_v13 = vmul.f32 %v443_v10, %v306_v11 }
 0x258   :  { %v316_v14 = vadd.f32 %v444_v12, %v311_v13 }
 0x25a   :  { %v317_v15 = vmax.f32 %v316_v14, 0.0 }
 0x25c   :  { %v318_v16 = vpack.c.bf16 %v317_v15, %v317_v15 }
 0x25e   :  { %526 = vmatmul.mubr.bf16.vlgmr.msra.gmra.mrb[4].mxu0 %v318_v16 }
 0x331   :  { %v405_v18 = vpop.f32.mrb[4].mxu0 }
 0x332   :  { %v406_v19 = vadd.f32 %v445_v17, %v405_v18  ;;  %v527_v20 = vpop.f32.mrb[5].mxu0 }
 0x333   :  { %v408_v21 = vpop.f32.mrb[6].mxu0 }
 0x334   :  { %411 = vst [vmem:[#allocation8] sm:$0xff] %v406_v19  ;;  %v528_v22 = vpop.f32.mrb[7].mxu0 }
 0x335   :  { %638 = shalt.err (!%p635_p0)
}
 0x336   :  { %s639_s25 = scalar_lea.hbm %s760_s3, 128 }
 0x337   :  { %p640_p1 = scmp.ne.s32.totalorder %s760_s3, %s639_s25  ;;  %p643_p2 = scmp.lt.u32.totalorder %s639_s25, %s760_s3 }
 0x339   :  { %p645_p3 = pnand %p643_p2, %p640_p1 }
 0x33b   :  { %648 = shalt.err (!%p645_p3)
}
 0x33c   :  { %421 = dma.vmem_to_hbm [thread:$0]  %s419_s21, 128, %s760_s3, [#allocation4]  }
 0x33d   :  { %653 = dma.done.wait [#allocation4], 128  }
 0x33e   :  { %654 = vsyncadd [#allocation4], 4294967168 }
 0x33f   :  { %425 = vsyncpa [#allocation3], 1 }
 0x340   :  { %426 = vsyncpa [#allocation6], 1 }
 0x341   :  { %427 = vsyncpa [#allocation4], 1 }

</bundles_post_ra>
